<compile_context>
chip_gen: v5e
topology: v5e:2x2
jax: 0.10.0
libtpu: 0.0.40
codegen_flags: <defaults>
</compile_context>

<pallas_src>
import math

import jax
import jax.numpy as jnp
from jax.experimental import pallas as pl
from jax.experimental.pallas import tpu as pltpu

MAX_VAL = 10000.0


# --------------------------------------------------------------------------
# Kernels (one grid step == one batch element, all heads fused)
# --------------------------------------------------------------------------
def _global_attn_kernel(q_ref, k_ref, v_ref, m_ref, out_ref, p_ref):
    # blocks: q/k/v (1, Hg, L, D), mask (1, 1, L, L) int8 (nonzero == masked)
    q = q_ref[0]                                  # (Hg, L, D)
    k = k_ref[0]                                  # (Hg, L, D)
    v = v_ref[0]                                  # (Hg, L, D)
    mask = m_ref[0, 0]                            # (L, L) int8

    d = q.shape[-1]
    s = jnp.einsum('hqd,hkd->hqk', q, k,
                   preferred_element_type=jnp.float32) * (1.0 / math.sqrt(d))
    s = jnp.where(mask[None, :, :] != 0, -MAX_VAL, s)

    s = s - jnp.max(s, axis=-1, keepdims=True)
    e = jnp.exp(s)
    p = e * pl.reciprocal(jnp.sum(e, axis=-1, keepdims=True), approx=True)

    p_ref[0] = p
    out_ref[0] = jnp.einsum('hqk,hkd->hqd', p, v,
                            preferred_element_type=jnp.float32)


def _local_attn_kernel(q_ref, k_ref, v_ref, m_ref, pq_ref, pk_ref, rb_ref,
                       w_ref, out_ref, p_ref):
    # blocks: q/k/v (1, Hl, L, D); mask (1, 1, L, L) int8;
    #         pos_q/pos_k (Hl, L, D); rb = rel@w + bias (Hl, L, L); w (Hl, D).
    q = q_ref[0] + pq_ref[...]                    # (Hl, L, D) query + abs pos
    k = k_ref[0] + pk_ref[...]                    # (Hl, L, D) key   + abs pos
    v = v_ref[0]                                  # (Hl, L, D)
    mask = m_ref[0, 0]                            # (L, L)

    d = q.shape[-1]
    s = jnp.einsum('hqd,hkd->hqk', q, k,
                   preferred_element_type=jnp.float32) * (1.0 / math.sqrt(d))

    # reweight[h,i,j] = w_h.(rel[h,i,j] + v[h,i] + v[h,j]) + b_h
    #                 = rb[h,i,j] + vw[h,i] + vw[h,j]   (rb precomputed)
    vw = jnp.sum(v * w_ref[...][:, None, :], axis=-1)          # (Hl, L)
    s = s + rb_ref[...] + vw[:, :, None] + vw[:, None, :]

    s = jnp.where(mask[None, :, :] != 0, -MAX_VAL, s)
    s = s - jnp.max(s, axis=-1, keepdims=True)
    e = jnp.exp(s)
    p = e * pl.reciprocal(jnp.sum(e, axis=-1, keepdims=True), approx=True)

    p_ref[0] = p
    out_ref[0] = jnp.einsum('hqk,hkd->hqd', p, v,
                            preferred_element_type=jnp.float32)


# --------------------------------------------------------------------------
# Wrappers (pallas_call plumbing)
# --------------------------------------------------------------------------
def global_attention(q, k, v, mask_i8):
    b, h, l, d = q.shape
    qkv_spec = pl.BlockSpec((1, h, l, d), lambda bi: (bi, 0, 0, 0))
    mask_spec = pl.BlockSpec((1, 1, l, l), lambda bi: (bi, 0, 0, 0))
    return pl.pallas_call(
        _global_attn_kernel,
        out_shape=(jax.ShapeDtypeStruct((b, h, l, d), jnp.float32),
                   jax.ShapeDtypeStruct((b, h, l, l), jnp.float32)),
        grid=(b,),
        in_specs=[qkv_spec, qkv_spec, qkv_spec, mask_spec],
        out_specs=(pl.BlockSpec((1, h, l, d), lambda bi: (bi, 0, 0, 0)),
                   pl.BlockSpec((1, h, l, l), lambda bi: (bi, 0, 0, 0))),
        compiler_params=pltpu.CompilerParams(
            dimension_semantics=("parallel",)),
    )(q, k, v, mask_i8)


def local_attention(q, k, v, mask_i8, pos_q, pos_k, rel_bias, mlp_w):
    b, h, l, d = q.shape
    qkv_spec = pl.BlockSpec((1, h, l, d), lambda bi: (bi, 0, 0, 0))
    mask_spec = pl.BlockSpec((1, 1, l, l), lambda bi: (bi, 0, 0, 0))
    # Head-invariant parameters: constant block index -> fetched once, not per batch.
    pos_spec = pl.BlockSpec((h, l, d), lambda bi: (0, 0, 0))
    rb_spec = pl.BlockSpec((h, l, l), lambda bi: (0, 0, 0))
    w_spec = pl.BlockSpec((h, d), lambda bi: (0, 0))
    return pl.pallas_call(
        _local_attn_kernel,
        out_shape=(jax.ShapeDtypeStruct((b, h, l, d), jnp.float32),
                   jax.ShapeDtypeStruct((b, h, l, l), jnp.float32)),
        grid=(b,),
        in_specs=[qkv_spec, qkv_spec, qkv_spec, mask_spec,
                  pos_spec, pos_spec, rb_spec, w_spec],
        out_specs=(pl.BlockSpec((1, h, l, d), lambda bi: (bi, 0, 0, 0)),
                   pl.BlockSpec((1, h, l, l), lambda bi: (bi, 0, 0, 0))),
        compiler_params=pltpu.CompilerParams(
            dimension_semantics=("parallel",)),
    )(q, k, v, mask_i8, pos_q, pos_k, rel_bias, mlp_w)


# --------------------------------------------------------------------------
# Module equivalent
# --------------------------------------------------------------------------
class Attention:
    """JAX/Pallas port of local_sasrec.Attention (eval mode: dropout = identity)."""

    def __init__(self, max_len, head_size, global_num, local_num, key):
        self.max_len = max_len
        self.head_size = head_size
        self.global_num = global_num
        self.local_num = local_num
        ks = jax.random.split(key, 5)
        if local_num > 0:
            # Raw parameters (mirror the torch module).
            self.abs_pos_emb_key = 0.02 * jax.random.normal(
                ks[0], (max_len, head_size * local_num), jnp.float32)
            self.abs_pos_emb_query = 0.02 * jax.random.normal(
                ks[1], (max_len, head_size * local_num), jnp.float32)
            self.rel_pos_emb = 0.02 * jax.random.normal(
                ks[2], (2 * max_len - 1, head_size * local_num), jnp.float32)
            pos_l = jnp.arange(max_len)[:, None]
            pos_r = jnp.arange(max_len)[None, :]
            self.distance = pos_r - pos_l + max_len - 1          # (max_len, max_len)
            # nn.Linear(head_size, 1) per local head: weight (1, head_size), bias (1,)
            self.mlp_w = 0.02 * jax.random.normal(
                ks[3], (local_num, head_size), jnp.float32)
            self.mlp_b = 0.02 * jax.random.normal(
                ks[4], (local_num,), jnp.float32)

            # --- parameter-only precomputes (done once, never re-DMA'd per head) ---
            index = self.distance[-1]                            # == arange(max_len)
            # same row-major reshape as torch .view(1, -1, l, d_k)
            self.pos_q = self.abs_pos_emb_query[index].reshape(
                local_num, max_len, head_size)
            self.pos_k = self.abs_pos_emb_key[index].reshape(
                local_num, max_len, head_size)
            # rel_bias[h,i,j] = w_h . rel_pos_emb[distance[i,j], h*D:(h+1)*D] + b_h
            emb_r = self.rel_pos_emb.reshape(2 * max_len - 1, local_num, head_size)
            relw = jnp.einsum('phd,hd->ph', emb_r, self.mlp_w)   # (2L-1, Hl)
            self.rel_bias = (relw[self.distance].transpose(2, 0, 1)
                             + self.mlp_b[:, None, None])        # (Hl, L, L)

    def __call__(self, query, key, value, mask):
        # mask: (B, 1, L, L) bool, True == masked
        mask_i8 = mask.astype(jnp.int8)

        value_g = p_attn_g = None
        if self.global_num > 0:
            q_g = query[:, :self.global_num]
            k_g = key[:, :self.global_num]
            v_g = value[:, :self.global_num]
            value_g, p_attn_g = global_attention(q_g, k_g, v_g, mask_i8)

        if self.local_num > 0:
            q_l = query[:, self.global_num:]
            k_l = key[:, self.global_num:]
            v_l = value[:, self.global_num:]
            value_l, p_attn_l = local_attention(
                q_l, k_l, v_l, mask_i8,
                self.pos_q, self.pos_k, self.rel_bias, self.mlp_w)
            if self.global_num > 0:
                return (jnp.concatenate([value_g, value_l], axis=1),
                        (p_attn_g, p_attn_l))
            return value_l, p_attn_l
        return value_g, p_attn_g
        # TODO(synk): dropout is stochastic; implemented as identity (eval mode).


# --------------------------------------------------------------------------
# Pure-JAX reference (independent of the in-kernel algebraic rewrite)
# --------------------------------------------------------------------------
def _reference(attn: Attention, q, k, v, mask):
    b, h, l, d_k = q.shape
    gn, ln = attn.global_num, attn.local_num
    qg, kg, vg = q[:, :gn], k[:, :gn], v[:, :gn]
    sg = jnp.einsum('bhid,bhjd->bhij', qg, kg) / math.sqrt(d_k)
    sg = jnp.where(mask, -MAX_VAL, sg)
    pg = jax.nn.softmax(sg, axis=-1)
    og = jnp.einsum('bhij,bhjd->bhid', pg, vg)

    ql, kl, vl = q[:, gn:], k[:, gn:], v[:, gn:]
    index = attn.distance[-1]
    pos_q = attn.abs_pos_emb_query[index].reshape(1, ln, l, d_k)
    pos_k = attn.abs_pos_emb_key[index].reshape(1, ln, l, d_k)
    ql = ql + pos_q
    kl = kl + pos_k
    sl = jnp.einsum('bhid,bhjd->bhij', ql, kl) / math.sqrt(d_k)
    rel = attn.rel_pos_emb[attn.distance].reshape(
        l, l, ln, d_k).transpose(2, 0, 1, 3)[None]
    inputs = rel + vl[:, :, :, None, :] + vl[:, :, None, :, :]    # (B, Hl, L, L, D)
    reweight = (jnp.einsum('bhijd,hd->bhij', inputs, attn.mlp_w)
                + attn.mlp_b[None, :, None, None])
    sl = sl + reweight
    sl = jnp.where(mask, -MAX_VAL, sl)
    pl_ = jax.nn.softmax(sl, axis=-1)
    ol = jnp.einsum('bhij,bhjd->bhid', pl_, vl)
    return jnp.concatenate([og, ol], axis=1), (pg, pl_)


# --------------------------------------------------------------------------
if __name__ == "__main__":
    max_len = 8
    head_size = 32
    global_num = 2
    local_num = 2
    b = 2
    h = global_num + local_num
    l, d_k = max_len, head_size

    key = jax.random.PRNGKey(0)
    k_param, k_q, k_k, k_v = jax.random.split(key, 4)

    attn = Attention(max_len, head_size, global_num, local_num, k_param)

    query = jax.random.normal(k_q, (b, h, l, d_k), jnp.float32)
    keyt = jax.random.normal(k_k, (b, h, l, d_k), jnp.float32)
    value = jax.random.normal(k_v, (b, h, l, d_k), jnp.float32)
    # causal mask: True (masked) for future positions, shape (B, 1, L, L)
    mask = jnp.triu(jnp.ones((l, l), dtype=bool), k=1)[None, None].repeat(b, axis=0)

    out, (p_g, p_l) = attn(query, keyt, value, mask)
    out = jax.block_until_ready(out)
    jax.block_until_ready(p_g)
    jax.block_until_ready(p_l)

    ref_out, (ref_pg, ref_pl) = _reference(attn, query, keyt, value, mask)
    assert out.shape == (b, h, l, d_k)
    assert p_g.shape == (b, global_num, l, l) and p_l.shape == (b, local_num, l, l)
    # Tolerance covers the EUP approximate-reciprocal softmax normalization.
    assert jnp.allclose(out, ref_out, atol=1e-2, rtol=1e-2)
    assert jnp.allclose(p_g, ref_pg, atol=1e-2, rtol=1e-2)
    assert jnp.allclose(p_l, ref_pl, atol=1e-2, rtol=1e-2)

    print("KERNEL_OK")
</pallas_src>

<mosaic_0001>
module attributes {stable_mosaic.version = 11 : i64} {
  func.func @_global_attn_kernel(%arg0: i32, %arg1: memref<1x2x8x32xf32, #tpu.memory_space<vmem>>, %arg2: memref<1x2x8x32xf32, #tpu.memory_space<vmem>>, %arg3: memref<1x2x8x32xf32, #tpu.memory_space<vmem>>, %arg4: memref<1x1x8x8xi8, #tpu.memory_space<vmem>>, %arg5: memref<1x2x8x32xf32, #tpu.memory_space<vmem>>, %arg6: memref<1x2x8x8xf32, #tpu.memory_space<vmem>>) attributes {dimension_semantics = [#tpu.dimension_semantics<parallel>], iteration_bounds = array<i64: 2>, scalar_prefetch = 0 : i64, scratch_operands = 0 : i64, tpu.core_type = #tpu.core_type<tc>, window_params = [{transform_indices = @transform_0, window_bounds = array<i64: 1, 2, 8, 32>}, {transform_indices = @transform_1, window_bounds = array<i64: 1, 2, 8, 32>}, {transform_indices = @transform_2, window_bounds = array<i64: 1, 2, 8, 32>}, {transform_indices = @transform_3, window_bounds = array<i64: 1, 1, 8, 8>}, {transform_indices = @transform_4, window_bounds = array<i64: 1, 2, 8, 32>}, {transform_indices = @transform_5, window_bounds = array<i64: 1, 2, 8, 8>}]} {
    %c0 = arith.constant 0 : index
    %c0_0 = arith.constant 0 : index
    %c0_1 = arith.constant 0 : index
    %c0_2 = arith.constant 0 : index
    %0 = vector.load %arg1[%c0, %c0_0, %c0_1, %c0_2] : memref<1x2x8x32xf32, #tpu.memory_space<vmem>>, vector<1x2x8x32xf32>
    %1 = vector.shape_cast %0 : vector<1x2x8x32xf32> to vector<2x8x32xf32>
    %c0_3 = arith.constant 0 : index
    %c0_4 = arith.constant 0 : index
    %c0_5 = arith.constant 0 : index
    %c0_6 = arith.constant 0 : index
    %2 = vector.load %arg2[%c0_3, %c0_4, %c0_5, %c0_6] : memref<1x2x8x32xf32, #tpu.memory_space<vmem>>, vector<1x2x8x32xf32>
    %3 = vector.shape_cast %2 : vector<1x2x8x32xf32> to vector<2x8x32xf32>
    %c0_7 = arith.constant 0 : index
    %c0_8 = arith.constant 0 : index
    %c0_9 = arith.constant 0 : index
    %c0_10 = arith.constant 0 : index
    %4 = vector.load %arg3[%c0_7, %c0_8, %c0_9, %c0_10] : memref<1x2x8x32xf32, #tpu.memory_space<vmem>>, vector<1x2x8x32xf32>
    %5 = vector.shape_cast %4 : vector<1x2x8x32xf32> to vector<2x8x32xf32>
    %c0_11 = arith.constant 0 : index
    %c0_12 = arith.constant 0 : index
    %c0_13 = arith.constant 0 : index
    %c0_14 = arith.constant 0 : index
    %6 = vector.load %arg4[%c0_11, %c0_12, %c0_13, %c0_14] : memref<1x1x8x8xi8, #tpu.memory_space<vmem>>, vector<1x1x8x8xi8>
    %7 = vector.shape_cast %6 : vector<1x1x8x8xi8> to vector<8x8xi8>
    "tpu.trace_start"() <{level = 10 : i32, message = "hqd,hkd->hqk"}> : () -> ()
    %cst = arith.constant dense<0.000000e+00> : vector<2x8x8xf32>
    %8 = tpu.matmul %1, %3, %cst {dimension_numbers = #tpu.dot_dimension_numbers<[2], [2], [1], [1], [0, 0, 0, 1, 1, 1], [0], [0]>} : vector<2x8x32xf32>, vector<2x8x32xf32>, vector<2x8x8xf32> -> vector<2x8x8xf32>
    "tpu.trace_stop"() : () -> ()
    %cst_15 = arith.constant 0.176776692 : f32
    %9 = vector.broadcast %cst_15 : f32 to vector<2x8x8xf32>
    %10 = arith.mulf %8, %9 : vector<2x8x8xf32>
    %11 = vector.shape_cast %7 : vector<8x8xi8> to vector<1x8x8xi8>
    %c0_i8 = arith.constant 0 : i8
    %12 = vector.broadcast %c0_i8 : i8 to vector<1x8x8xi8>
    %13 = arith.cmpi ne, %11, %12 : vector<1x8x8xi8>
    %cst_16 = arith.constant -1.000000e+04 : f32
    %14 = vector.shape_cast %13 : vector<1x8x8xi1> to vector<1x8x8xi1>
    %15 = vector.broadcast %14 : vector<1x8x8xi1> to vector<2x8x8xi1>
    %16 = vector.broadcast %cst_16 : f32 to vector<2x8x8xf32>
    %17 = arith.select %15, %16, %10 : vector<2x8x8xi1>, vector<2x8x8xf32>
    %cst_17 = arith.constant dense<0xFF800000> : vector<2x8xf32>
    %18 = vector.multi_reduction <maximumf>, %17, %cst_17 [2] : vector<2x8x8xf32> to vector<2x8xf32>
    %19 = vector.shape_cast %18 : vector<2x8xf32> to vector<2x8x1xf32>
    %20 = vector.broadcast %19 : vector<2x8x1xf32> to vector<2x8x8xf32>
    %21 = arith.subf %17, %20 : vector<2x8x8xf32>
    %22 = math.exp %21 : vector<2x8x8xf32>
    %cst_18 = arith.constant dense<0.000000e+00> : vector<2x8xf32>
    %23 = vector.multi_reduction <add>, %22, %cst_18 [2] : vector<2x8x8xf32> to vector<2x8xf32>
    %24 = vector.shape_cast %23 : vector<2x8xf32> to vector<2x8x1xf32>
    %25 = tpu.reciprocal %24 {approx = true} : vector<2x8x1xf32> -> vector<2x8x1xf32>
    %26 = vector.broadcast %25 : vector<2x8x1xf32> to vector<2x8x8xf32>
    %27 = arith.mulf %22, %26 : vector<2x8x8xf32>
    %c0_19 = arith.constant 0 : index
    %c0_20 = arith.constant 0 : index
    %c0_21 = arith.constant 0 : index
    %c0_22 = arith.constant 0 : index
    %28 = vector.load %arg6[%c0_19, %c0_20, %c0_21, %c0_22] : memref<1x2x8x8xf32, #tpu.memory_space<vmem>>, vector<1x2x8x8xf32>
    %29 = vector.shape_cast %28 : vector<1x2x8x8xf32> to vector<2x8x8xf32>
    %30 = vector.shape_cast %27 : vector<2x8x8xf32> to vector<1x2x8x8xf32>
    tpu.vector_store %arg6[%c0_19, %c0_20, %c0_21, %c0_22], %30 {strides = array<i32>} : memref<1x2x8x8xf32, #tpu.memory_space<vmem>>, vector<1x2x8x8xf32>,
    "tpu.trace_start"() <{level = 10 : i32, message = "hqk,hkd->hqd"}> : () -> ()
    %cst_23 = arith.constant dense<0.000000e+00> : vector<2x8x32xf32>
    %31 = tpu.matmul %27, %5, %cst_23 {dimension_numbers = #tpu.dot_dimension_numbers<[2], [1], [1], [2], [0, 0, 0, 1, 1, 2], [0], [0]>} : vector<2x8x8xf32>, vector<2x8x32xf32>, vector<2x8x32xf32> -> vector<2x8x32xf32>
    "tpu.trace_stop"() : () -> ()
    %c0_24 = arith.constant 0 : index
    %c0_25 = arith.constant 0 : index
    %c0_26 = arith.constant 0 : index
    %c0_27 = arith.constant 0 : index
    %32 = vector.load %arg5[%c0_24, %c0_25, %c0_26, %c0_27] : memref<1x2x8x32xf32, #tpu.memory_space<vmem>>, vector<1x2x8x32xf32>
    %33 = vector.shape_cast %32 : vector<1x2x8x32xf32> to vector<2x8x32xf32>
    %34 = vector.shape_cast %31 : vector<2x8x32xf32> to vector<1x2x8x32xf32>
    tpu.vector_store %arg5[%c0_24, %c0_25, %c0_26, %c0_27], %34 {strides = array<i32>} : memref<1x2x8x32xf32, #tpu.memory_space<vmem>>, vector<1x2x8x32xf32>,
    return
  }
  func.func @transform_0(%arg0: i32) -> (i32, i32, i32, i32) {
    %c0_i32 = arith.constant 0 : i32
    %c0_i32_0 = arith.constant 0 : i32
    %c0_i32_1 = arith.constant 0 : i32
    %c0_i32_2 = arith.constant 0 : i32
    return %arg0, %c0_i32, %c0_i32_0, %c0_i32_1 : i32, i32, i32, i32
  }
  func.func @transform_1(%arg0: i32) -> (i32, i32, i32, i32) {
    %c0_i32 = arith.constant 0 : i32
    %c0_i32_0 = arith.constant 0 : i32
    %c0_i32_1 = arith.constant 0 : i32
    %c0_i32_2 = arith.constant 0 : i32
    return %arg0, %c0_i32, %c0_i32_0, %c0_i32_1 : i32, i32, i32, i32
  }
  func.func @transform_2(%arg0: i32) -> (i32, i32, i32, i32) {
    %c0_i32 = arith.constant 0 : i32
    %c0_i32_0 = arith.constant 0 : i32
    %c0_i32_1 = arith.constant 0 : i32
    %c0_i32_2 = arith.constant 0 : i32
    return %arg0, %c0_i32, %c0_i32_0, %c0_i32_1 : i32, i32, i32, i32
  }
  func.func @transform_3(%arg0: i32) -> (i32, i32, i32, i32) {
    %c0_i32 = arith.constant 0 : i32
    %c0_i32_0 = arith.constant 0 : i32
    %c0_i32_1 = arith.constant 0 : i32
    %c0_i32_2 = arith.constant 0 : i32
    return %arg0, %c0_i32, %c0_i32_0, %c0_i32_1 : i32, i32, i32, i32
  }
  func.func @transform_4(%arg0: i32) -> (i32, i32, i32, i32) {
    %c0_i32 = arith.constant 0 : i32
    %c0_i32_0 = arith.constant 0 : i32
    %c0_i32_1 = arith.constant 0 : i32
    %c0_i32_2 = arith.constant 0 : i32
    return %arg0, %c0_i32, %c0_i32_0, %c0_i32_1 : i32, i32, i32, i32
  }
  func.func @transform_5(%arg0: i32) -> (i32, i32, i32, i32) {
    %c0_i32 = arith.constant 0 : i32
    %c0_i32_0 = arith.constant 0 : i32
    %c0_i32_1 = arith.constant 0 : i32
    %c0_i32_2 = arith.constant 0 : i32
    return %arg0, %c0_i32, %c0_i32_0, %c0_i32_1 : i32, i32, i32, i32
  }
}

</mosaic_0001>

<bundles_post_ra>
// kernel: tpu_custom_call.1
= control target key start
LH: loop header
LB: loop body
LE: loop exit
PB: predicated region body
PF: predicated region fallthrough
CT: control target
= control target key end

     0   :  { %s1370_s0 = inlined_call_operand.hbm [shape: f32[2,2,8,32], index: 0, kind: input, shape index: {}]   ;;  %s1371_s1 = inlined_call_operand.hbm [shape: f32[2,2,8,32], index: 1, kind: input, shape index: {}]   ;;  %s1372_s2 = inlined_call_operand.hbm [shape: f32[2,2,8,32], index: 2, kind: input, shape index: {}]   ;;  %s1373_s3 = inlined_call_operand.hbm [shape: s8[2,1,8,8], index: 3, kind: input, shape index: {}]   ;;  %s1374_s4 = inlined_call_operand.hbm [shape: f32[2,2,8,32], index: 4, kind: output, shape index: {0}]   ;;  %s1375_s5 = inlined_call_operand.hbm [shape: f32[2,2,8,8], index: 5, kind: output, shape index: {1}]  }
   0x1   :  { %1382 = sst [smem:[#allocation22_spill]] %s1370_s0 }
   0x2   :  { %1383 = sst [smem:[#allocation23_spill]] %s1371_s1 }
   0x3   :  { %11 = vsyncpa [#allocation3], 0 }
   0x4   :  { %13 = vsyncpa [#allocation3 + $0x1], 0 }
   0x5   :  { %14 = vsyncpa [#allocation6], 0 }
   0x6   :  { %16 = vsyncpa [#allocation6 + $0x1], 0 }
   0x7   :  { %17 = vsyncpa [#allocation9], 0 }
   0x8   :  { %19 = vsyncpa [#allocation9 + $0x1], 0 }
   0x9   :  { %20 = vsyncpa [#allocation4], 0 }
   0xa   :  { %22 = vsyncpa [#allocation4 + $0x1], 0 }
   0xb   :  { %23 = vsyncpa [#allocation12], 0 }
   0xc   :  { %25 = vsyncpa [#allocation12 + $0x1], 0  ;;  %s1113_s18 = smov 0   ;;  %s1115_s19 = smov 0  }
   0xd   :  { %s1117_s20 = smov 0   ;;  %s1119_s21 = smov 0  }
   0xe LB: > { %1384 = sst [smem:[#allocation18_spill]] %s1072_s20  ;;  %s1134_s22 = sadd.s32 4294967295, %s1076_s21   ;;  %s1076_s21 = sphi %s1119_s21, %s1397_s21   ;;  %s1072_s20 = sphi %s1117_s20, %s1399_s20   ;;  %s1068_s19 = sphi %s1115_s19, %s1401_s19   ;;  %s1064_s18 = sphi %s1113_s18, %s1400_s18  }
   0xf   : > { %s731_s23 = sadd.s32 4294967294, %s1076_s21   ;;  %s1138_s24 = sadd.s32 1, %s1076_s21  }
  0x10   : > { %1385 = sst [smem:[#allocation19_spill]] %s1138_s24  ;;  %s38_s25 = sadd.s32 1, %s1072_s20 }
  0x11   : > { %s35_s26 = ssub.s32 %s1076_s21, %s1138_s24  ;;  %p45_p0 = scmp.ne.s32.totalorder %s1072_s20, %s1068_s19 }
  0x12   : > { %p36_p1 = scmp.eq.s32.totalorder %s35_s26, 0  ;;  %p46_p2 = scmp.eq.s32.totalorder %s1076_s21, 0 }
  0x13   : > { %p51_p3 = scmp.ne.s32.totalorder %s1068_s19, %s1064_s18  ;;  %p52_p4 = scmp.eq.s32.totalorder %s1134_s22, 0 }
  0x14   : > { %s1150_s27 = scalar_select %p36_p1, %s1072_s20, %s38_s25  }
  0x15   : > { %p47_p5 = por %p46_p2, %p45_p0  ;;  %p1152_p6 = por %p52_p4, %p51_p3 }
  0x16   : > { %1386 = sst [smem:[#allocation20_spill]] %s1150_s27  ;;  %p153_p7 = scmp.eq.s32.totalorder %s1134_s22, 1 }
  0x17   : > { %p159_p8 = scmp.eq.s32.totalorder %s731_s23, 1  ;;  %p733_p9 = scmp.ge.s32.totalorder %s1076_s21, 2 }
  0x18   : > { %p803_p10 = scmp.lt.s32.totalorder %s1076_s21, 2  ;;  %p1159_p11 = por %p153_p7, %p45_p0 }
  0x19   : > { %p1163_p12 = por %p159_p8, %p51_p3  ;;  %s1168_s6 = sand.u32 1, %s1072_s20  }
  0x1a   : > { %s1171_s7 = sshll.u32 %s1076_s21, 4  ;;  %s1174_s8 = sshll.u32 %s1168_s6, 4 }
  0x1b   : > { %s1389_s30 = scalar_select %p1163_p12, 1, 0 }
  0x1c   : > { %p1176_p13 = pnand %p803_p10, %p47_p5  ;;  %s227_s10 = sand.u32 1, %s1076_s21  }
  0x1d   : > { %1390 = sst [smem:[#allocation21_spill]] %s1389_s30  ;;  %s231_s14 = scalar_lea.vmem [#allocation5], %s1174_s8 }
  0x1e   : > { %s1392_s1 = sld [smem:[#allocation23_spill]]  ;;  %s239_s15 = sshll.u32 %s231_s14, 4  ;;  %s240_s15 = int_to_ptr.vmem [resolvable:$true] %s239_s15 }
  0x1f   : > { %p745_p0 = scmp.ge.s32.totalorder %s1076_s21, 1  ;;  %s1187_s17 = scalar_lea.sflag [#allocation6], %s227_s10 }
  0x20   : > { %p854_p2 = pneg %p1176_p13 }
  0x24   : > { %s236_s13 = scalar_lea.hbm %s1392_s1, %s1171_s7  ;;  %s857_s12 = scalar_lea.hbm %s1392_s1, 32 }
  0x25   : > { %s237_s16 = sshll.u32 %s236_s13, 4  ;;  %s238_s16 = int_to_ptr.hbm [resolvable:$true] %s237_s16 }
  0x26   : > { %s850_s23 = sshra.s32 %s238_s16, 4  ;;  %s851_s23 = int_to_ptr.hbm [resolvable:$true] %s850_s23 }
  0x27   : > { %s852_s25 = scalar_lea.hbm %s851_s23, 16  ;;  %p858_p5 = scmp.lt.s32.totalorder %s851_s23, %s1392_s1 }
  0x28   : > { %p853_p1 = scmp.ne.s32.totalorder %s851_s23, %s852_s25  ;;  %p859_p7 = scmp.lt.s32.totalorder %s857_s12, %s852_s25 }
  0x2a   : > { %p855_p3 = pnand %p854_p2, %p853_p1  ;;  %p860_p8 = por %p859_p7, %p858_p5 }
  0x2c   : > { %p856_p4 = pneg %p855_p3 }
  0x2e   : > { %p861_p10 = pnand %p860_p8, %p856_p4 }
  0x30   : > { %864 = shalt.err (!%p861_p10)
}
  0x31   : > { %s1379_s10 = smov 128   ;;  %s1079_s27 = smov 8  }
  0x32   : > { %789 = dma.hbm_to_vmem [thread:$0]  (!%p1176_p13), %s238_s16, 256, %s240_s15, %s1187_s17, %s1379_s10, %s1379_s10, %s1079_s27  }
  0x33   : > { %p288_p1 = scmp.lt.s32.totalorder %s1076_s21, 3  ;;  %s1393_s0 = sld [smem:[#allocation22_spill]] }
  0x34   : > { %s209_s13 = scalar_lea.vmem [#allocation2], %s1174_s8  ;;  %s206_s1 = scalar_lea.sflag [#allocation3], %s1168_s6 }
  0x35   : > { %p1213_p3 = pnand %p745_p0, %p288_p1  ;;  %s217_s14 = sshll.u32 %s209_s13, 4  ;;  %s218_s14 = int_to_ptr.vmem [resolvable:$true] %s217_s14 }
  0x39   : > { %s214_s26 = scalar_lea.hbm %s1393_s0, %s1171_s7  ;;  %s887_s23 = scalar_lea.hbm %s1393_s0, 32 }
  0x3a   : > { %s215_s12 = sshll.u32 %s214_s26, 4  ;;  %s216_s12 = int_to_ptr.hbm [resolvable:$true] %s215_s12 }
  0x3b   : > { %s880_s20 = sshra.s32 %s216_s12, 4  ;;  %s881_s20 = int_to_ptr.hbm [resolvable:$true] %s880_s20 }
  0x3c   : > { %s882_s24 = scalar_lea.hbm %s881_s20, 16  ;;  %p888_p0 = scmp.lt.s32.totalorder %s881_s20, %s1393_s0 }
  0x3d   : > { %p883_p4 = scmp.ne.s32.totalorder %s881_s20, %s882_s24  ;;  %p889_p8 = scmp.lt.s32.totalorder %s887_s23, %s882_s24 }
  0x3f   : > { %p885_p5 = pnand %p883_p4, %p854_p2  ;;  %p890_p10 = por %p889_p8, %p888_p0 }
  0x41   : > { %p886_p7 = pneg %p885_p5 }
  0x43   : > { %p891_p1 = pnand %p890_p10, %p886_p7 }
  0x45   : > { %894 = shalt.err (!%p891_p1)
}
  0x46   : > { %s1395_s26 = smov 128   ;;  %s258_s16 = scalar_lea.hbm %s1372_s2, %s1171_s7 }
  0x47   : > { %786 = dma.hbm_to_vmem [thread:$0]  (!%p1176_p13), %s216_s12, 256, %s218_s14, %s206_s1, %s1395_s26, %s1395_s26, %s1079_s27  }
  0x48   : > { %s253_s30 = scalar_lea.vmem [#allocation7], %s1174_s8  ;;  %s259_s20 = sshll.u32 %s258_s16, 4  ;;  %s260_s20 = int_to_ptr.hbm [resolvable:$true] %s259_s20 }
  0x49   : > { %s261_s10 = sshll.u32 %s253_s30, 4  ;;  %s910_s24 = sshra.s32 %s260_s20, 4  ;;  %s262_s10 = int_to_ptr.vmem [resolvable:$true] %s261_s10  ;;  %s911_s24 = int_to_ptr.hbm [resolvable:$true] %s910_s24 }
  0x4a   : > { %s912_s23 = scalar_lea.hbm %s911_s24, 16  ;;  %s917_s1 = scalar_lea.hbm %s1372_s2, 32 }
  0x4b   : > { %p913_p4 = scmp.ne.s32.totalorder %s911_s24, %s912_s23  ;;  %p918_p0 = scmp.lt.s32.totalorder %s911_s24, %s1372_s2 }
  0x4c   : > { %p919_p8 = scmp.lt.s32.totalorder %s917_s1, %s912_s23 }
  0x4d   : > { %p915_p5 = pnand %p913_p4, %p854_p2 }
  0x4e   : > { %p920_p10 = por %p919_p8, %p918_p0 }
  0x4f   : > { %p916_p7 = pneg %p915_p5 }
  0x51   : > { %p921_p1 = pnand %p920_p10, %p916_p7 }
  0x53   : > { %924 = shalt.err (!%p921_p1)
}
  0x54   : > { %792 = dma.hbm_to_vmem [thread:$0]  (!%p1176_p13), %s260_s20, 256, %s262_s10, %s1187_s17, %s1395_s26, %s1395_s26, %s1079_s27  }
  0x55   : > { %s743_s0 = sshll.u32 %s1168_s6, 1  ;;  %s744_s30 = sshll.u32 %s1076_s21, 1 }
  0x56   : > { %s279_s13 = scalar_lea.hbm %s1373_s3, %s744_s30  ;;  %s275_s16 = scalar_lea.vmem [#allocation8], %s743_s0 }
  0x57   : > { %s281_s15 = sshll.u32 %s279_s13, 4  ;;  %s283_s24 = sshll.u32 %s275_s16, 4  ;;  %s282_s15 = int_to_ptr.hbm [resolvable:$true] %s281_s15  ;;  %s284_s24 = int_to_ptr.vmem [resolvable:$true] %s283_s24 }
  0x58   : > { %s272_s23 = scalar_lea.sflag [#allocation9], %s1168_s6  ;;  %s940_s25 = sshra.s32 %s282_s15, 4  ;;  %s941_s25 = int_to_ptr.hbm [resolvable:$true] %s940_s25 }
  0x59   : > { %s942_s1 = scalar_lea.hbm %s941_s25, 2  ;;  %s947_s26 = scalar_lea.hbm %s1373_s3, 4 }
  0x5a   : > { %p943_p4 = scmp.ne.s32.totalorder %s941_s25, %s942_s1  ;;  %p948_p0 = scmp.lt.s32.totalorder %s941_s25, %s1373_s3 }
  0x5b   : > { %p949_p8 = scmp.lt.s32.totalorder %s947_s26, %s942_s1 }
  0x5c   : > { %p945_p5 = pnand %p943_p4, %p854_p2 }
  0x5d   : > { %p950_p10 = por %p949_p8, %p948_p0 }
  0x5e   : > { %p946_p7 = pneg %p945_p5 }
  0x60   : > { %p951_p1 = pnand %p950_p10, %p946_p7 }
  0x62   : > { %954 = shalt.err (!%p951_p1)
}
  0x63   : > { %795 = dma.hbm_to_vmem [thread:$0]  (!%p1176_p13), %s282_s15, 32, %s284_s24, %s272_s23  }
  0x64   : > { %292 = sbr.rel (%p1213_p3) target bundleno = 642 (0x282), region = 36  ;;  %s1273_s6 = sand.u32 (!%p1213_p3), 1, %s1068_s19  }
  0x65   : > { %s1276_s12 = sshll.u32 (!%p1213_p3), %s1273_s6, 4  ;;  %s295_s14 = scalar_lea.sflag (!%p1213_p3), [#allocation3], %s1273_s6 }
  0x66   : > { %s298_s0 = scalar_lea.vmem (!%p1213_p3), [#allocation2], %s1276_s12 }
  0x69   : > { %1043 = dma.done.wait (%p1152_p6), %s295_s14, 256  }
  0x6a   : > { %1045 = vsyncadd (%p1152_p6), %s295_s14, 4294967040  ;;  %s304_s9 = sand.u32 1, %s1134_s22   ;;  %s308_s30 = scalar_lea.vmem [#allocation5], %s1276_s12 }
  0x6b   : > { %s305_s11 = scalar_lea.sflag [#allocation6], %s304_s9 }
  0x6c   : > { %1047 = dma.done.wait (%p1152_p6), %s305_s11, 512  }
  0x6d   : > { %1049 = vsyncadd (%p1152_p6), %s305_s11, 4294966784  ;;  %s749_s7 = sshll.u32 %s1273_s6, 1  ;;  %s318_s8 = scalar_lea.vmem [#allocation7], %s1276_s12 }
  0x6e   : > { %s325_s13 = scalar_lea.sflag [#allocation9], %s1273_s6  ;;  %s328_s15 = scalar_lea.vmem [#allocation8], %s749_s7 }
  0x6f   : > { %1051 = dma.done.wait (%p1152_p6), %s325_s13, 32  }
  0x70   : > { %1053 = vsyncadd (%p1152_p6), %s325_s13, 4294967264  ;;  %vm385_vm0 = vcmask 261120   ;;  %v380_v0 = vld [vmem:[%s308_s30] sm:$0xff]  ;;  %v381_v1 = vld [vmem:[%s308_s30 + $0x8] sm:$0xff]  ;;  %v1080_v5 = vmov 0   ;;  %vm448_vm3 = vcmask 64512  }
  0x71   : > { %752 = vmatpush.xpose.msk.msra.mxu0 %vm385_vm0, %v380_v0  ;;  %v378_v2 = vld [vmem:[%s298_s0] sm:$0xff]  ;;  %754 = vmatpush.xpose.msk.msra.mxu1 %vm385_vm0, %v381_v1  ;;  %v379_v3 = vld [vmem:[%s298_s0 + $0x8] sm:$0xff]  ;;  %s375_s28 = scalar_lea.vmem [#allocation11], %s1276_s12  ;;  %s769_s16 = sshll.u32 %s1134_s22, 4 }
  0x72   : > { %v384_v4 = vld [vmem:[%s328_s15] sm:$0x3]  ;;  %v383_v27 = vld [vmem:[%s318_s8 + $0x8] sm:$0xff]  ;;  %s556_s24 = sshll.u32 %s375_s28, 4  ;;  %s555_s1 = scalar_lea.hbm %s1375_s5, %s769_s16  ;;  %s557_s24 = int_to_ptr.vmem [resolvable:$true] %s556_s24 }
  0x73   : > { %vm440_vm1 = vnez %v384_v4  ;;  %v382_v26 = vld [vmem:[%s318_s8] sm:$0xff]  ;;  %514 = vmatpush.msra.mxu3 %v383_v27  ;;  %s558_s27 = sshll.u32 %s555_s1, 4  ;;  %s527_s17 = scalar_lea.sflag [#allocation12], %s1273_s6  ;;  %s559_s27 = int_to_ptr.hbm [resolvable:$true] %s558_s27 }
  0x74   : > { %753 = vmatmul.msk.f32.vlgmr.msra.gmra.mxu0 %vm385_vm0, %v378_v2  ;;  %755 = vmatmul.msk.f32.vlgmr.msra.gmra.mxu1 %vm385_vm0, %v379_v3  ;;  %v441_v6 = vsel %vm440_vm1, 16843009, %v1080_v5  ;;  %s984_s26 = sshra.s32 %s559_s27, 4  ;;  %s990_s22 = scalar_lea.hbm %s1375_s5, 32  ;;  %s985_s26 = int_to_ptr.hbm [resolvable:$true] %s984_s26 }
  0x75   : > { %v442_v7 = vunpack.c.0.s8 %v441_v6  ;;  %491 = vmatpush.msra.mxu2 %v382_v26  ;;  %s986_s10 = scalar_lea.hbm %s985_s26, 16  ;;  %p991_p3 = scmp.lt.s32.totalorder %s985_s26, %s1375_s5 }
  0x76   : > { %p987_p6 = scmp.ne.s32.totalorder %s985_s26, %s986_s10  ;;  %p992_p4 = scmp.lt.s32.totalorder %s990_s22, %s986_s10 }
  0x77   : > { %vm443_vm2 = vcmp.ne.s32.totalorder %v442_v7, 0 }
  0x78   : > { %p988_p13 = pnand %p987_p6, %p1159_p11  ;;  %p993_p5 = por %p992_p4, %p991_p3 }
  0x7a   : > { %p989_p2 = pneg %p988_p13 }
  0x7c   : > { %p994_p7 = pnand %p993_p5, %p989_p2 }
  0xf1   : > { %v409_v8 = vpop.f32.mrf.mxu0  ;;  %v435_v9 = vpop.f32.mrf.mxu1 }
  0xf2   : > { %v438_v10 = vmul.f32 0.17677669, %v409_v8  ;;  %v439_v12 = vmul.f32 0.17677669, %v435_v9 }
  0xf4   : > { %v446_v11 = vsel %vm443_vm2, -10000.0, %v438_v10  ;;  %v447_v14 = vsel %vm443_vm2, -10000.0, %v439_v12 }
  0xf5   : > { %v449_v13 = vsel %vm448_vm3, %v446_v11, -inf  ;;  %v452_v15 = vsel %vm448_vm3, %v447_v14, -inf }
  0xf6   : > { %450 = vmax.xlane.f32.xlu0 %v449_v13 }
  0xfe   : > { %453 = vmax.xlane.f32.xlu0 %v452_v15 }
 0x169   : > { %v451_v16 = vpop.xlane.xlu0 %450 }
 0x16a   : > { %v455_v17 = vsub.f32 %v446_v11, %v451_v16 }
 0x16c   : > { %v457_v18 = vmul.f32 1.442695, %v455_v17 }
 0x16e   : > { %842 = vpow2.f32 %v457_v18 }
 0x171   : > { %v454_v19 = vpop.xlane.xlu0 %453 }
 0x172   : > { %v456_v20 = vsub.f32 %v447_v14, %v454_v19 }
 0x174   : > { %v843_v21 = vpop.eup %842  ;;  %v459_v22 = vmul.f32 1.442695, %v456_v20 }
 0x175   : > { %v461_v23 = vsel %vm448_vm3, %v843_v21, 0.0 }
 0x176   : > { %844 = vpow2.f32 %v459_v22  ;;  %462 = vadd.xlane.f32.xlu1 %v461_v23 }
 0x17c   : > { %v845_v24 = vpop.eup %844 }
 0x17d   : > { %v464_v25 = vsel %vm448_vm3, %v845_v24, 0.0 }
 0x17e   : > { %465 = vadd.xlane.f32.xlu1 %v464_v25 }
 0x1e9   : > { %v463_v28 = vpop.xlane.xlu1 %462 }
 0x1ea   : > { %846 = vrcp.f32 %v463_v28 }
 0x1f0   : > { %v847_v29 = vpop.eup %846 }
 0x1f1   : > { %v466_v30 = vpop.xlane.xlu1 %465  ;;  %v469_v31 = vmul.f32 %v847_v29, %v843_v21 }
 0x1f2   : > { %848 = vrcp.f32 %v466_v30 }
 0x1f3   : > { %471 = vst.msk [vmem:[%s375_s28] sm:$0xff] %vm448_vm3, %v469_v31  ;;  %756 = vmatmul.msk.f32.vlgmr.msra.gmra.mxu2 %vm448_vm3, %v469_v31 }
 0x1f8   : > { %v849_v32 = vpop.eup %848 }
 0x1f9   : > { %v470_v33 = vmul.f32 %v849_v32, %v845_v24 }
 0x1fb   : > { %472 = vst.msk [vmem:[%s375_s28 + $0x8] sm:$0xff] %vm448_vm3, %v470_v33  ;;  %757 = vmatmul.msk.f32.vlgmr.msra.gmra.mxu3 %vm448_vm3, %v470_v33 }
 0x1fc   : > { %997 = shalt.err (!%p994_p7)
}
 0x1fd   : > { %s1081_s11 = smov 128   ;;  %s1082_s30 = smov 8  }
 0x1fe   : > { %780 = dma.vmem_to_hbm [thread:$0]  (%p1159_p11), %s557_s24, 256, %s559_s27, %s527_s17, %s1081_s11, %s1081_s11, %s1082_s30  }
 0x1ff   : > { %s368_s7 = scalar_lea.vmem [#allocation10], %s1276_s12  ;;  %s538_s15 = scalar_lea.hbm %s1374_s4, %s769_s16 }
 0x200   : > { %s539_s28 = sshll.u32 %s368_s7, 4  ;;  %s541_s23 = sshll.u32 %s538_s15, 4  ;;  %s540_s28 = int_to_ptr.vmem [resolvable:$true] %s539_s28  ;;  %s542_s23 = int_to_ptr.hbm [resolvable:$true] %s541_s23 }
 0x201   : > { %s522_s25 = scalar_lea.sflag [#allocation4], %s1273_s6  ;;  %s1012_s1 = sshra.s32 %s542_s23, 4  ;;  %s1013_s1 = int_to_ptr.hbm [resolvable:$true] %s1012_s1 }
 0x202   : > { %s1014_s24 = scalar_lea.hbm %s1013_s1, 16  ;;  %s1018_s17 = scalar_lea.hbm %s1374_s4, 32 }
 0x203   : > { %p1015_p0 = scmp.ne.s32.totalorder %s1013_s1, %s1014_s24  ;;  %p1019_p1 = scmp.lt.s32.totalorder %s1013_s1, %s1374_s4 }
 0x204   : > { %p1020_p6 = scmp.lt.s32.totalorder %s1018_s17, %s1014_s24 }
 0x205   : > { %p1016_p8 = pnand %p1015_p0, %p1159_p11 }
 0x206   : > { %p1021_p13 = por %p1020_p6, %p1019_p1 }
 0x207   : > { %p1017_p10 = pneg %p1016_p8 }
 0x209   : > { %p1022_p2 = pnand %p1021_p13, %p1017_p10 }
 0x276   : > { %v493_v34 = vpop.f32.mrf.mxu2 }
 0x277   : > { %519 = vst.msk [vmem:[%s368_s7] sm:$0xff] %vm385_vm0, %v493_v34 }
 0x27e   : > { %v516_v35 = vpop.f32.mrf.mxu3 }
 0x27f   : > { %520 = vst.msk [vmem:[%s368_s7 + $0x8] sm:$0xff] %vm385_vm0, %v516_v35 }
 0x280   : > { %1025 = shalt.err (!%p1022_p2)
}
 0x281   : > { %779 = dma.vmem_to_hbm [thread:$0]  (%p1159_p11), %s540_s28, 256, %s542_s23, %s522_s25, %s1081_s11, %s1081_s11, %s1082_s30  }
 0x282 PF: > { %s573_s10 = sand.u32 1, %s1064_s18   ;;  %p797_p3 = pnand %p733_p9, %p1163_p12 }
 0x283   : > { %s574_s20 = scalar_lea.sflag [#allocation4], %s573_s10 }
 0x284   : > { %p798_p4 = pneg %p797_p3 }
 0x286   : > { %1055 = dma.done.wait (%p798_p4), %s574_s20, 256  }
 0x287   : > { %1057 = vsyncadd (%p798_p4), %s574_s20, 4294967040  ;;  %s584_s14 = scalar_lea.sflag [#allocation12], %s573_s10 }
 0x288   : > { %1059 = dma.done.wait (%p798_p4), %s584_s14, 256  }
 0x289   : > { %1061 = vsyncadd (%p798_p4), %s584_s14, 4294967040  ;;  %s1397_s21 = sld [smem:[#allocation19_spill]]  ;;  %s1400_s18 = smov %s1068_s19 }
 0x28a   : > { %s1398_s29 = sld [smem:[#allocation18_spill]] }
 0x28b   : > { %s1399_s20 = sld [smem:[#allocation20_spill]] }
 0x28f   : > { %p28_p11 = scmp.ge.s32.totalorder %s1397_s21, 4  }
 0x290   : > { %s1401_s19 = smov %s1398_s29 }
 0x291   :  { %30 = sbr.rel (!%p28_p11) target bundleno = 14 (0xe), region = 135 }
 0x296   :  { %590 = vsyncpa [#allocation3], 1 }
 0x297   :  { %592 = vsyncpa [#allocation3 + $0x1], 1 }
 0x298   :  { %593 = vsyncpa [#allocation6], 1 }
 0x299   :  { %595 = vsyncpa [#allocation6 + $0x1], 1 }
 0x29a   :  { %596 = vsyncpa [#allocation9], 1 }
 0x29b   :  { %598 = vsyncpa [#allocation9 + $0x1], 1 }
 0x29c   :  { %599 = vsyncpa [#allocation4], 1 }
 0x29d   :  { %601 = vsyncpa [#allocation4 + $0x1], 1 }
 0x29e   :  { %602 = vsyncpa [#allocation12], 1 }
 0x29f   :  { %604 = vsyncpa [#allocation12 + $0x1], 1 }

</bundles_post_ra>
